<compile_context>
chip_gen: v7x
topology: tpu7x:2x2x1
jax: 0.10.0
libtpu: 0.0.40
codegen_flags: <defaults>
</compile_context>

<pallas_src>
import math

import jax
import jax.numpy as jnp
from jax.experimental import pallas as pl
from jax.experimental.pallas import tpu as pltpu


_TARGET_BLOCK_BYTES = 4 * 1024 * 1024   # ~4 MiB blocks: amortize grid-step overhead
_VMEM_LIMIT_BYTES = 48 * 1024 * 1024    # < v7x 64 MiB physical; safe on v5e/v6e


def _round_up(a, b):
    return (a + b - 1) // b * b


def _round_down(a, b):
    return (a // b) * b


# ----------------------------- Pallas kernels -----------------------------

def _sigmoid_kernel(x_ref, o_ref):
    x = x_ref[...].astype(jnp.float32)
    o_ref[...] = (1.0 / (1.0 + jnp.exp(-x))).astype(o_ref.dtype)


# ---- reductions over the LAST (lane) axis: block view (TR, K) ----

def _softmax_last_kernel(x_ref, o_ref):
    x = x_ref[...].astype(jnp.float32)
    m = jnp.max(x, axis=-1, keepdims=True)
    e = jnp.exp(x - m)
    s = jnp.sum(e, axis=-1, keepdims=True)
    o_ref[...] = (e / s).astype(o_ref.dtype)          # exact divide: torch parity


def _logsoftmax_last_kernel(x_ref, o_ref):
    x = x_ref[...].astype(jnp.float32)
    m = jnp.max(x, axis=-1, keepdims=True)
    z = x - m
    lse = jnp.log(jnp.sum(jnp.exp(z), axis=-1, keepdims=True))
    o_ref[...] = (z - lse).astype(o_ref.dtype)


def _argmax_last_kernel(x_ref, o_ref):
    x = x_ref[...].astype(jnp.float32)
    r, k = x.shape
    idx = jax.lax.broadcasted_iota(jnp.int32, (r, k), 1)
    m = jnp.max(x, axis=-1, keepdims=True)
    masked = jnp.where(x == m, idx, jnp.int32(k))     # k = +inf sentinel
    o_ref[...] = jnp.min(masked, axis=-1, keepdims=True)


# ---- reductions over the MIDDLE (sublane) axis: block view (TP, K, TQ) ----
# Used for softmax2d / softmax(dim=1) / logsoftmax(dim=1) / argmax2d without
# any HBM transpose; the spatial axis stays lane-dense, and several `pre`
# slices are packed per block.

def _softmax_mid_kernel(x_ref, o_ref):
    x = x_ref[...].astype(jnp.float32)                # (TP, K, TQ)
    m = jnp.max(x, axis=1, keepdims=True)
    e = jnp.exp(x - m)
    s = jnp.sum(e, axis=1, keepdims=True)
    o_ref[...] = (e / s).astype(o_ref.dtype)


def _logsoftmax_mid_kernel(x_ref, o_ref):
    x = x_ref[...].astype(jnp.float32)
    m = jnp.max(x, axis=1, keepdims=True)
    z = x - m
    lse = jnp.log(jnp.sum(jnp.exp(z), axis=1, keepdims=True))
    o_ref[...] = (z - lse).astype(o_ref.dtype)


def _argmax_mid_kernel(x_ref, o_ref):
    x = x_ref[...].astype(jnp.float32)                # (TP, K, TQ)
    tp, k, tq = x.shape
    idx = jax.lax.broadcasted_iota(jnp.int32, (tp, k, tq), 1)
    m = jnp.max(x, axis=1, keepdims=True)
    masked = jnp.where(x == m, idx, jnp.int32(k))
    o_ref[...] = jnp.min(masked, axis=1, keepdims=True)   # (TP, 1, TQ) lane-dense


# ----------------------------- pallas_call glue ----------------------------

def _elementwise(kernel, x, jnp_tail_fn):
    """Lane-dense elementwise map; <128-element tails handled with plain jnp
    (no whole-array pad + slice round-trip through HBM)."""
    if x.size == 0:
        return x
    n = int(x.size)
    flat = x.reshape(-1)
    lanes = None
    for cand in (2048, 1024, 512, 256, 128):
        if n % cand == 0:
            lanes = cand
            break
    if lanes is None:
        lanes = 128
        n_main = _round_down(n, lanes)
    else:
        n_main = n
    if n_main == 0:                      # fewer than 128 elements total
        return jnp_tail_fn(x)
    head = (flat if n_main == n else flat[:n_main]).reshape(-1, lanes)
    rows = head.shape[0]
    itemsize = jnp.dtype(x.dtype).itemsize
    tr = max(8, _round_down(_TARGET_BLOCK_BYTES // (lanes * itemsize), 8))
    tr = min(tr, _round_up(rows, 8))
    out = pl.pallas_call(
        kernel,
        out_shape=jax.ShapeDtypeStruct(head.shape, x.dtype),
        grid=(pl.cdiv(rows, tr),),
        in_specs=[pl.BlockSpec((tr, lanes), lambda i: (i, 0))],
        out_specs=pl.BlockSpec((tr, lanes), lambda i: (i, 0)),
        compiler_params=pltpu.CompilerParams(
            dimension_semantics=("parallel",),
            vmem_limit_bytes=_VMEM_LIMIT_BYTES),
    )(head)
    out_flat = out.reshape(-1)
    if n_main != n:
        out_flat = jnp.concatenate([out_flat, jnp_tail_fn(flat[n_main:])])
    return out_flat.reshape(x.shape)


def _reduce_last(kernel, x2, out_cols, out_dtype):
    """Row-independent reduction / normalization over the last axis."""
    rows, k = x2.shape
    itemsize = jnp.dtype(x2.dtype).itemsize
    tr = max(8, _round_down(_TARGET_BLOCK_BYTES // max(k * itemsize, 1), 8))
    tr = min(tr, _round_up(rows, 8))
    return pl.pallas_call(
        kernel,
        out_shape=jax.ShapeDtypeStruct((rows, out_cols), out_dtype),
        grid=(pl.cdiv(rows, tr),),
        in_specs=[pl.BlockSpec((tr, k), lambda i: (i, 0))],
        out_specs=pl.BlockSpec((tr, out_cols), lambda i: (i, 0)),
        compiler_params=pltpu.CompilerParams(
            dimension_semantics=("parallel",),
            vmem_limit_bytes=_VMEM_LIMIT_BYTES),
    )(x2)


def _reduce_mid(kernel, x3, out_k, out_dtype):
    """Reduction over the middle (sublane) axis of a (pre, K, post) view.
    `post` stays on the lanes (no transposes); multiple `pre` slices are
    packed per block so small K*post doesn't mean tiny DMAs / tiny blocks."""
    pre, k, post = x3.shape
    itemsize = jnp.dtype(x3.dtype).itemsize
    if post >= 128:
        tq = max(128, _round_down(_TARGET_BLOCK_BYTES // max(k * itemsize, 1), 128))
        tq = min(tq, _round_up(post, 128))
    else:
        tq = post                        # full (small) lane dim
    tp = max(1, _TARGET_BLOCK_BYTES // max(k * tq * itemsize, 1))
    tp = min(tp, pre)
    return pl.pallas_call(
        kernel,
        out_shape=jax.ShapeDtypeStruct((pre, out_k, post), out_dtype),
        grid=(pl.cdiv(pre, tp), pl.cdiv(post, tq)),
        in_specs=[pl.BlockSpec((tp, k, tq), lambda p, q: (p, 0, q))],
        out_specs=pl.BlockSpec((tp, out_k, tq), lambda p, q: (p, 0, q)),
        compiler_params=pltpu.CompilerParams(
            dimension_semantics=("parallel", "parallel"),
            vmem_limit_bytes=_VMEM_LIMIT_BYTES),
    )(x3)


def _argmax_flat(x):
    """torch.argmax(x) (dim=None): two-pass streamed flat argmax.

    Pass 1 ('parallel' grid, megacore-shardable): each block reduces its
    (TP, 8, 128) slab of the flattened input to lane-dense (8, 128) partials
    of (running max, chunk index) — pure VPU compare/select, no serial scratch.
    Pass 2: tiny plain-jnp reduction over the (nb*8, 128) partials.
    """
    n = int(x.size)
    flat = x.reshape(-1)
    CH = 8 * 128                          # one (8,128) chunk of the flat array
    nch = n // CH
    rem = n - nch * CH
    if nch == 0:                          # fewer than 1024 elements: plain jnp
        return jnp.argmax(flat).astype(jnp.int32)
    main = flat if rem == 0 else flat[:nch * CH]
    x3 = main.reshape(nch, 8, 128)
    itemsize = jnp.dtype(x.dtype).itemsize
    tp = max(1, _TARGET_BLOCK_BYTES // (CH * itemsize))
    tp = min(tp, nch)
    nb = pl.cdiv(nch, tp)

    def _partial_kernel(x_ref, pmax_ref, pidx_ref):
        i = pl.program_id(0)
        xb = x_ref[...].astype(jnp.float32)                    # (tp, 8, 128)
        c = jax.lax.broadcasted_iota(jnp.int32, (tp, 8, 128), 0)
        gc = i * tp + c                                        # global chunk index
        xb = jnp.where(gc < nch, xb, -jnp.inf)                 # mask ragged block
        m = jnp.max(xb, axis=0)                                # (8, 128)
        cand = jnp.where(xb == m[None], gc, jnp.int32(nch))
        pmax_ref[...] = m
        pidx_ref[...] = jnp.min(cand, axis=0)

    pmax, pidx = pl.pallas_call(
        _partial_kernel,
        out_shape=(jax.ShapeDtypeStruct((nb * 8, 128), jnp.float32),
                   jax.ShapeDtypeStruct((nb * 8, 128), jnp.int32)),
        grid=(nb,),
        in_specs=[pl.BlockSpec((tp, 8, 128), lambda i: (i, 0, 0))],
        out_specs=(pl.BlockSpec((8, 128), lambda i: (i, 0)),
                   pl.BlockSpec((8, 128), lambda i: (i, 0))),
        compiler_params=pltpu.CompilerParams(
            dimension_semantics=("parallel",),
            vmem_limit_bytes=_VMEM_LIMIT_BYTES),
    )(x3)

    # Pass 2: tiny final reduce over (nb, 8, 128) partials in plain jnp.
    s = jnp.arange(8, dtype=jnp.int32).reshape(1, 8, 1)
    l = jnp.arange(128, dtype=jnp.int32).reshape(1, 1, 128)
    flat_idx = (pidx.reshape(nb, 8, 128) * 8 + s) * 128 + l    # global flat index
    pm = pmax.reshape(nb, 8, 128)
    gmax = jnp.max(pm)
    best = jnp.min(jnp.where(pm == gmax, flat_idx, jnp.int32(2**31 - 1)))
    if rem:
        tail = flat[nch * CH:].astype(jnp.float32)
        tidx = (nch * CH + jnp.argmax(tail)).astype(jnp.int32)
        best = jnp.where(jnp.max(tail) > gmax, tidx, best)
    return best


def _torch_default_softmax_dim(ndim):
    # mirrors torch.nn.functional._get_softmax_dim (deprecated implicit dim)
    return 0 if ndim in (0, 1, 3) else 1


def _softmax_impl(x, dim, log):
    if x.ndim == 0:
        return jnp.zeros_like(x) if log else jnp.ones_like(x)
    d = _torch_default_softmax_dim(x.ndim) if dim is None else dim
    d = d % x.ndim
    shape = x.shape
    k = shape[d]
    pre = math.prod(shape[:d])
    post = math.prod(shape[d + 1:])
    if post == 1:       # reduction over the (effective) last axis
        kern = _logsoftmax_last_kernel if log else _softmax_last_kernel
        out = _reduce_last(kern, x.reshape(pre, k), k, x.dtype)
        return out.reshape(shape)
    kern = _logsoftmax_mid_kernel if log else _softmax_mid_kernel
    out = _reduce_mid(kern, x.reshape(pre, k, post), k, x.dtype)
    return out.reshape(shape)


def _argmax_impl(x, dim):
    if dim is None:
        return _argmax_flat(x)
    d = dim % x.ndim
    shape = x.shape
    k = shape[d]
    pre = math.prod(shape[:d])
    post = math.prod(shape[d + 1:])
    out_shape = shape[:d] + shape[d + 1:]
    if post == 1:
        out = _reduce_last(_argmax_last_kernel, x.reshape(pre, k), 1, jnp.int32)
        return out[:, 0].reshape(out_shape)
    out = _reduce_mid(_argmax_mid_kernel, x.reshape(pre, k, post), 1, jnp.int32)
    return out[:, 0, :].reshape(out_shape)


# ------------------------------ Activation ---------------------------------

class Activation:
    """JAX/Pallas port of the PyTorch `Activation` module."""

    def __init__(self, name, **params):
        self.name = name
        self.params = params
        if name is None or name == "identity":
            # Identity: no HBM round-trip through the TensorCore.
            self._fn = lambda x: x
        elif name == "sigmoid":
            self._fn = lambda x: _elementwise(_sigmoid_kernel, x, jax.nn.sigmoid)
        elif name == "softmax2d":
            # Spec maps 'softmax2d' -> nn.Softmax(dim=1).
            self._fn = lambda x: _softmax_impl(x, 1, log=False)
        elif name == "softmax":
            dim = params.get("dim", None)
            self._fn = lambda x, _d=dim: _softmax_impl(x, _d, log=False)
        elif name == "logsoftmax":
            dim = params.get("dim", None)
            self._fn = lambda x, _d=dim: _softmax_impl(x, _d, log=True)
        elif name == "argmax":
            dim = params.get("dim", None)
            self._fn = lambda x, _d=dim: _argmax_impl(x, _d)
        elif name == "argmax2d":
            self._fn = lambda x: _argmax_impl(x, 1)
        elif callable(name):
            self._fn = name(**params)
        else:
            raise ValueError(
                "Activation should be callable/sigmoid/softmax/logsoftmax/"
                "None; got {}".format(name))

    def __call__(self, x):
        return self._fn(x)


# --------------------------------- main -------------------------------------

if __name__ == "__main__":
    key = jax.random.PRNGKey(0)
    x = jax.random.normal(key, (2, 4, 16, 16), dtype=jnp.float32)  # NCHW

    ok = True

    # identity
    y = jax.block_until_ready(Activation("identity")(x))
    ok &= bool(jnp.allclose(y, x))

    # sigmoid
    y = jax.block_until_ready(Activation("sigmoid")(x))
    ok &= bool(jnp.allclose(y, jax.nn.sigmoid(x), atol=1e-4))

    # softmax2d (dim=1 over channels) -- exact division now
    y = jax.block_until_ready(Activation("softmax2d")(x))
    ok &= bool(jnp.allclose(y, jax.nn.softmax(x, axis=1), atol=1e-4))

    # softmax(dim=-1)
    y = jax.block_until_ready(Activation("softmax", dim=-1)(x))
    ok &= bool(jnp.allclose(y, jax.nn.softmax(x, axis=-1), atol=1e-4))

    # logsoftmax(dim=1)
    y = jax.block_until_ready(Activation("logsoftmax", dim=1)(x))
    ok &= bool(jnp.allclose(y, jax.nn.log_softmax(x, axis=1), atol=1e-4))

    # argmax2d (dim=1)
    y = jax.block_until_ready(Activation("argmax2d")(x))
    ok &= bool(jnp.array_equal(y, jnp.argmax(x, axis=1)))
    ok &= (y.shape == (2, 16, 16))

    # argmax over the last dim
    y = jax.block_until_ready(Activation("argmax", dim=3)(x))
    ok &= bool(jnp.array_equal(y, jnp.argmax(x, axis=3)))

    # argmax (dim=None -> global flatten)
    y = jax.block_until_ready(Activation("argmax")(x))
    ok &= bool(int(y) == int(jnp.argmax(x)))

    print("KERNEL_OK" if ok else "MISMATCH")
</pallas_src>

<mosaic_0001>
module attributes {stable_mosaic.version = 11 : i64} {
  func.func @_sigmoid_kernel(%arg0: i32, %arg1: memref<8x2048xf32, #tpu.memory_space<vmem>>, %arg2: memref<8x2048xf32, #tpu.memory_space<vmem>>) attributes {dimension_semantics = [#tpu.dimension_semantics<parallel>], iteration_bounds = array<i64: 1>, scalar_prefetch = 0 : i64, scratch_operands = 0 : i64, tpu.core_type = #tpu.core_type<tc>, window_params = [{transform_indices = @transform_0, window_bounds = array<i64: 8, 2048>}, {transform_indices = @transform_1, window_bounds = array<i64: 8, 2048>}]} {
    %c0 = arith.constant 0 : index
    %c0_0 = arith.constant 0 : index
    %0 = vector.load %arg1[%c0, %c0_0] : memref<8x2048xf32, #tpu.memory_space<vmem>>, vector<8x2048xf32>
    %cst = arith.constant 0.000000e+00 : f32
    %1 = vector.broadcast %cst : f32 to vector<8x2048xf32>
    %2 = arith.subf %1, %0 : vector<8x2048xf32>
    %3 = math.exp %2 : vector<8x2048xf32>
    %cst_1 = arith.constant 1.000000e+00 : f32
    %4 = vector.broadcast %cst_1 : f32 to vector<8x2048xf32>
    %5 = arith.addf %4, %3 : vector<8x2048xf32>
    %cst_2 = arith.constant 1.000000e+00 : f32
    %6 = vector.broadcast %cst_2 : f32 to vector<8x2048xf32>
    %7 = arith.divf %6, %5 : vector<8x2048xf32>
    %c0_3 = arith.constant 0 : index
    %c0_4 = arith.constant 0 : index
    %8 = vector.load %arg2[%c0_3, %c0_4] : memref<8x2048xf32, #tpu.memory_space<vmem>>, vector<8x2048xf32>
    tpu.vector_store %arg2[%c0_3, %c0_4], %7 {strides = array<i32>} : memref<8x2048xf32, #tpu.memory_space<vmem>>, vector<8x2048xf32>,
    return
  }
  func.func @transform_0(%arg0: i32) -> (i32, i32) {
    %c0_i32 = arith.constant 0 : i32
    %c0_i32_0 = arith.constant 0 : i32
    return %arg0, %c0_i32 : i32, i32
  }
  func.func @transform_1(%arg0: i32) -> (i32, i32) {
    %c0_i32 = arith.constant 0 : i32
    %c0_i32_0 = arith.constant 0 : i32
    return %arg0, %c0_i32 : i32, i32
  }
}

</mosaic_0001>

<bundles_post_ra>
// kernel: tpu_custom_call.1
= control target key start
LH: loop header
LB: loop body
LE: loop exit
PB: predicated region body
PF: predicated region fallthrough
CT: control target
= control target key end

     0   :  { %6 = vsyncpa [#allocation3], 0  ;;  %s328_s0 = inlined_call_operand.hbm [shape: f32[1,2048], index: 0, kind: input, shape index: {}]   ;;  %s329_s1 = inlined_call_operand.hbm [shape: f32[1,2048], index: 1, kind: output, shape index: {}]  }
   0x1   :  { %7 = vsyncpa [#allocation4], 0 }
   0x2   :  { %12 = vsyncadd [#allocation3], 1792  ;;  %s284_s6 = smov [#allocation2]   ;;  %s236_s10 = scalar_lea.hbm %s328_s0, 256 }
   0x3   :  { %s13_s7 = sshll.u32 %s284_s6, 4  ;;  %p237_p0 = scmp.ne.s32.totalorder %s328_s0, %s236_s10  ;;  %s14_s7 = int_to_ptr.vmem [resolvable:$true] %s13_s7 }
   0x4   :  { %p240_p1 = scmp.lt.u32.totalorder %s236_s10, %s328_s0 }
   0x6   :  { %p242_p2 = pnand %p240_p1, %p237_p0 }
   0x8   :  { %245 = shalt.err (!%p242_p2)
}
   0x9   :  { %s246_s15 = scalar_lea.vmem %s14_s7, 256  ;;  %s250_s16 = scalar_lea.vmem %s14_s7, 2048 }
   0xa   :  { %p247_p3 = scmp.ne.s32.totalorder %s14_s7, %s246_s15  ;;  %p251_p4 = scmp.lt.s32.totalorder %s14_s7, %s14_s7 }
   0xb   :  { %p252_p5 = scmp.lt.s32.totalorder %s250_s16, %s246_s15 }
   0xd   :  { %p253_p6 = por %p252_p5, %p251_p4 }
   0xf   :  { %p254_p7 = pnand %p253_p6, %p247_p3 }
  0x11   :  { %257 = shalt.err (!%p254_p7)
}
  0x12   :  { %s285_s17 = smov 256   ;;  %s286_s18 = smov 16  }
  0x13   :  { %19 = dma.hbm_to_vmem [thread:$0]  %s328_s0, 256, %s14_s7, [#allocation3], %s285_s17, %s285_s17, %s286_s18  }
  0x14   :  { %280 = dma.done.wait [#allocation3], 2048  }
  0x15   :  { %281 = vsyncadd [#allocation3], 4294965248  ;;  %v23_v0 = vld [vmem:[#allocation2] sm:$0xff]  ;;  %v24_v1 = vld [vmem:[#allocation2 + $0x8] sm:$0xff] }
  0x16   :  { %v25_v2 = vld [vmem:[#allocation2 + $0x10] sm:$0xff]  ;;  %v39_v3 = vsub.f32 0.0, %v23_v0  ;;  %v40_v4 = vsub.f32 0.0, %v24_v1  ;;  %v26_v6 = vld [vmem:[#allocation2 + $0x18] sm:$0xff]  ;;  %v27_v7 = vld [vmem:[#allocation2 + $0x20] sm:$0xff] }
  0x17   :  { %v41_v5 = vsub.f32 0.0, %v25_v2  ;;  %v28_v8 = vld [vmem:[#allocation2 + $0x28] sm:$0xff]  ;;  %v42_v9 = vsub.f32 0.0, %v26_v6  ;;  %v43_v10 = vsub.f32 0.0, %v27_v7  ;;  %v29_v12 = vld [vmem:[#allocation2 + $0x30] sm:$0xff]  ;;  %v30_v13 = vld [vmem:[#allocation2 + $0x38] sm:$0xff] }
  0x18   :  { %v44_v11 = vsub.f32 0.0, %v28_v8  ;;  %v31_v14 = vld [vmem:[#allocation2 + $0x40] sm:$0xff]  ;;  %v55_v15 = vmul.f32 1.442695, %v39_v3  ;;  %v57_v16 = vmul.f32 1.442695, %v40_v4 }
  0x19   :  { %v59_v17 = vmul.f32 1.442695, %v41_v5  ;;  %v61_v18 = vmul.f32 1.442695, %v42_v9  ;;  %v63_v19 = vmul.f32 1.442695, %v43_v10 }
  0x1a   :  { %172 = vpow2.f32 %v55_v15  ;;  %v45_v20 = vsub.f32 0.0, %v29_v12  ;;  %v46_v21 = vsub.f32 0.0, %v30_v13  ;;  %v47_v22 = vsub.f32 0.0, %v31_v14  ;;  %v32_v23 = vld [vmem:[#allocation2 + $0x48] sm:$0xff]  ;;  %v33_v24 = vld [vmem:[#allocation2 + $0x50] sm:$0xff]  ;;  %v34_v25 = vld [vmem:[#allocation2 + $0x58] sm:$0xff] }
  0x1b   :  { %174 = vpow2.f32 %v57_v16  ;;  %v65_v26 = vmul.f32 1.442695, %v44_v11  ;;  %v48_v27 = vsub.f32 0.0, %v32_v23  ;;  %v35_v28 = vld [vmem:[#allocation2 + $0x60] sm:$0xff]  ;;  %v49_v30 = vsub.f32 0.0, %v33_v24  ;;  %v36_v50 = vld [vmem:[#allocation2 + $0x68] sm:$0xff] }
  0x1c   :  { %176 = vpow2.f32 %v59_v17  ;;  %v67_v29 = vmul.f32 1.442695, %v45_v20  ;;  %v69_v31 = vmul.f32 1.442695, %v46_v21  ;;  %v50_v32 = vsub.f32 0.0, %v34_v25  ;;  %v37_v53 = vld [vmem:[#allocation2 + $0x70] sm:$0xff] }
  0x1d   :  { %178 = vpow2.f32 %v61_v18  ;;  %v71_v33 = vmul.f32 1.442695, %v47_v22  ;;  %v51_v34 = vsub.f32 0.0, %v35_v28  ;;  %v73_v35 = vmul.f32 1.442695, %v48_v27  ;;  %v38_v56 = vld [vmem:[#allocation2 + $0x78] sm:$0xff] }
  0x1e   :  { %180 = vpow2.f32 %v63_v19  ;;  %v75_v36 = vmul.f32 1.442695, %v49_v30  ;;  %v77_v37 = vmul.f32 1.442695, %v50_v32  ;;  %v52_v59 = vsub.f32 0.0, %v36_v50 }
  0x1f   :  { %182 = vpow2.f32 %v65_v26  ;;  %v79_v38 = vmul.f32 1.442695, %v51_v34  ;;  %v53_v62 = vsub.f32 0.0, %v37_v53  ;;  %v54_v1 = vsub.f32 0.0, %v38_v56 }
  0x20   :  { %184 = vpow2.f32 %v67_v29  ;;  %v81_v6 = vmul.f32 1.442695, %v52_v59 }
  0x21   :  { %186 = vpow2.f32 %v69_v31  ;;  %v83_v9 = vmul.f32 1.442695, %v53_v62  ;;  %v85_v11 = vmul.f32 1.442695, %v54_v1 }
  0x22   :  { %188 = vpow2.f32 %v71_v33 }
  0x23   :  { %190 = vpow2.f32 %v73_v35 }
  0x24   :  { %v173_v39 = vpop.eup %172  ;;  %192 = vpow2.f32 %v75_v36 }
  0x25   :  { %v175_v40 = vpop.eup %174  ;;  %v87_v41 = vadd.f32 1.0, %v173_v39  ;;  %194 = vpow2.f32 %v77_v37 }
  0x26   :  { %v177_v42 = vpop.eup %176  ;;  %v88_v43 = vadd.f32 1.0, %v175_v40  ;;  %196 = vpow2.f32 %v79_v38 }
  0x27   :  { %v179_v44 = vpop.eup %178  ;;  %198 = vrcp.f32 %v87_v41  ;;  %v89_v45 = vadd.f32 1.0, %v177_v42 }
  0x28   :  { %v181_v46 = vpop.eup %180  ;;  %200 = vrcp.f32 %v88_v43  ;;  %v90_v47 = vadd.f32 1.0, %v179_v44 }
  0x29   :  { %v183_v48 = vpop.eup %182  ;;  %202 = vrcp.f32 %v89_v45  ;;  %v91_v49 = vadd.f32 1.0, %v181_v46 }
  0x2a   :  { %v185_v51 = vpop.eup %184  ;;  %204 = vrcp.f32 %v90_v47  ;;  %v92_v52 = vadd.f32 1.0, %v183_v48 }
  0x2b   :  { %v187_v54 = vpop.eup %186  ;;  %206 = vrcp.f32 %v91_v49  ;;  %v93_v55 = vadd.f32 1.0, %v185_v51 }
  0x2c   :  { %v189_v57 = vpop.eup %188  ;;  %208 = vrcp.f32 %v92_v52  ;;  %v94_v58 = vadd.f32 1.0, %v187_v54 }
  0x2d   :  { %v191_v60 = vpop.eup %190  ;;  %210 = vrcp.f32 %v93_v55  ;;  %v95_v61 = vadd.f32 1.0, %v189_v57 }
  0x2e   :  { %v193_v63 = vpop.eup %192  ;;  %212 = vrcp.f32 %v94_v58  ;;  %v96_v0 = vadd.f32 1.0, %v191_v60 }
  0x2f   :  { %v195_v2 = vpop.eup %194  ;;  %214 = vrcp.f32 %v95_v61  ;;  %v97_v3 = vadd.f32 1.0, %v193_v63 }
  0x30   :  { %v197_v4 = vpop.eup %196  ;;  %216 = vrcp.f32 %v96_v0  ;;  %v98_v5 = vadd.f32 1.0, %v195_v2 }
  0x31   :  { %v199_v7 = vpop.eup %198  ;;  %218 = vrcp.f32 %v97_v3  ;;  %v99_v8 = vadd.f32 1.0, %v197_v4 }
  0x32   :  { %v201_v10 = vpop.eup %200  ;;  %135 = vst [vmem:[#allocation5] sm:$0xff] %v199_v7  ;;  %220 = vrcp.f32 %v98_v5 }
  0x33   :  { %v203_v12 = vpop.eup %202  ;;  %136 = vst [vmem:[#allocation5 + $0x8] sm:$0xff] %v201_v10  ;;  %222 = vrcp.f32 %v99_v8 }
  0x34   :  { %v205_v13 = vpop.eup %204  ;;  %137 = vst [vmem:[#allocation5 + $0x10] sm:$0xff] %v203_v12  ;;  %224 = vpow2.f32 %v81_v6 }
  0x35   :  { %v207_v14 = vpop.eup %206  ;;  %138 = vst [vmem:[#allocation5 + $0x18] sm:$0xff] %v205_v13  ;;  %226 = vpow2.f32 %v83_v9 }
  0x36   :  { %v209_v15 = vpop.eup %208  ;;  %139 = vst [vmem:[#allocation5 + $0x20] sm:$0xff] %v207_v14  ;;  %228 = vpow2.f32 %v85_v11 }
  0x37   :  { %v211_v16 = vpop.eup %210  ;;  %140 = vst [vmem:[#allocation5 + $0x28] sm:$0xff] %v209_v15 }
  0x38   :  { %v213_v17 = vpop.eup %212  ;;  %141 = vst [vmem:[#allocation5 + $0x30] sm:$0xff] %v211_v16 }
  0x39   :  { %v215_v18 = vpop.eup %214  ;;  %142 = vst [vmem:[#allocation5 + $0x38] sm:$0xff] %v213_v17 }
  0x3a   :  { %v217_v19 = vpop.eup %216  ;;  %143 = vst [vmem:[#allocation5 + $0x40] sm:$0xff] %v215_v18 }
  0x3b   :  { %v219_v20 = vpop.eup %218  ;;  %144 = vst [vmem:[#allocation5 + $0x48] sm:$0xff] %v217_v19 }
  0x3c   :  { %v221_v21 = vpop.eup %220  ;;  %145 = vst [vmem:[#allocation5 + $0x50] sm:$0xff] %v219_v20 }
  0x3d   :  { %v223_v22 = vpop.eup %222  ;;  %146 = vst [vmem:[#allocation5 + $0x58] sm:$0xff] %v221_v21 }
  0x3e   :  { %v225_v23 = vpop.eup %224  ;;  %147 = vst [vmem:[#allocation5 + $0x60] sm:$0xff] %v223_v22 }
  0x3f   :  { %v227_v24 = vpop.eup %226  ;;  %v100_v25 = vadd.f32 1.0, %v225_v23 }
  0x40   :  { %v229_v26 = vpop.eup %228  ;;  %v101_v27 = vadd.f32 1.0, %v227_v24 }
  0x41   :  { %230 = vrcp.f32 %v100_v25  ;;  %v102_v28 = vadd.f32 1.0, %v229_v26 }
  0x42   :  { %232 = vrcp.f32 %v101_v27 }
  0x43   :  { %234 = vrcp.f32 %v102_v28 }
  0x4b   :  { %v231_v29 = vpop.eup %230 }
  0x4c   :  { %v233_v30 = vpop.eup %232  ;;  %148 = vst [vmem:[#allocation5 + $0x68] sm:$0xff] %v231_v29 }
  0x4d   :  { %v235_v31 = vpop.eup %234  ;;  %149 = vst [vmem:[#allocation5 + $0x70] sm:$0xff] %v233_v30 }
  0x4e   :  { %150 = vst [vmem:[#allocation5 + $0x78] sm:$0xff] %v235_v31 }
  0x4f   :  { %155 = vsyncadd [#allocation4], 1792  ;;  %s287_s0 = smov [#allocation5]  }
  0x50   :  { %s156_s21 = sshll.u32 %s287_s0, 4  ;;  %s157_s21 = int_to_ptr.vmem [resolvable:$true] %s156_s21 }
  0x51   :  { %s258_s22 = scalar_lea.vmem %s157_s21, 256  ;;  %s262_s23 = scalar_lea.vmem %s157_s21, 2048 }
  0x52   :  { %p259_p8 = scmp.ne.s32.totalorder %s157_s21, %s258_s22  ;;  %p263_p9 = scmp.lt.s32.totalorder %s157_s21, %s157_s21 }
  0x53   :  { %p264_p10 = scmp.lt.s32.totalorder %s262_s23, %s258_s22 }
  0x55   :  { %p265_p11 = por %p264_p10, %p263_p9 }
  0x57   :  { %p266_p12 = pnand %p265_p11, %p259_p8 }
  0x59   :  { %269 = shalt.err (!%p266_p12)
}
  0x5a   :  { %s270_s26 = scalar_lea.hbm %s329_s1, 256 }
  0x5b   :  { %p271_p13 = scmp.ne.s32.totalorder %s329_s1, %s270_s26  ;;  %p274_p0 = scmp.lt.u32.totalorder %s270_s26, %s329_s1 }
  0x5d   :  { %p276_p1 = pnand %p274_p0, %p271_p13 }
  0x5f   :  { %279 = shalt.err (!%p276_p1)
}
  0x60   :  { %162 = dma.vmem_to_hbm [thread:$0]  %s157_s21, 256, %s329_s1, [#allocation4], %s285_s17, %s285_s17, %s286_s18  }
  0x61   :  { %282 = dma.done.wait [#allocation4], 2048  }
  0x62   :  { %283 = vsyncadd [#allocation4], 4294965248 }
  0x63   :  { %166 = vsyncpa [#allocation3], 1 }
  0x64   :  { %167 = vsyncpa [#allocation4], 1 }

</bundles_post_ra>
